<compile_context>
chip_gen: v7x
topology: tpu7x:2x2x1
jax: 0.10.0
libtpu: 0.0.40
codegen_flags: <defaults>
</compile_context>

<pallas_src>
import functools

import jax
import jax.numpy as jnp
from jax.experimental import pallas as pl
from jax.experimental.pallas import tpu as pltpu

LANE = 128
SUBLANE = 16          # bf16 sublane packing


def _round_up(x, m):
    return (x + m - 1) // m * m


def _weight_norm(v, g):
    """torch parametrizations.weight_norm(dim=0): w = g * v / ||v||_{per out-ch}."""
    norm = jnp.sqrt(jnp.sum(v * v, axis=(1, 2), keepdims=True))
    return v * (g.reshape(-1, 1, 1) / norm)


def _temporal_block_kernel(xw_ref, w1_ref, b1_ref, w2_ref, b2_ref,
                           wd_ref, bd_ref, out_ref,
                           *, K, dilation, pad, front, TL, T, has_downsample):
    """One (batch, time-tile) step of the fused TemporalBlock forward.

    xw_ref : (1, front + TL, Cin_p)  bf16  overlapping input window
             (window row w  ==  global x row t0 - front + w, t0 = tile*TL;
              rows with negative global index hold zeros)
    w1_ref : (K, Cin_p, Cout_p)      bf16
    b1_ref : (1, Cout_p)             f32
    w2_ref : (K, Cout_p, Cout_p)     bf16
    b2_ref : (1, Cout_p)             f32
    wd_ref : (Cin_p, Cout_p)         bf16  (zeros when unused)
    bd_ref : (1, Cout_p)             f32
    out_ref: (1, TL, Cout_p)         f32
    """
    e = front - 2 * pad              # alignment rows at the window front
    H = pad + TL                     # rows of h1 computed (pad halo + TL)

    # ---- causal dilated conv #1 + bias + ReLU (dropout1 = identity) ----
    acc = jnp.dot(xw_ref[0, e:e + H, :], w1_ref[0],
                  preferred_element_type=jnp.float32)
    for k in range(1, K):                                  # static unroll over taps
        acc = acc + jnp.dot(
            xw_ref[0, e + k * dilation:e + k * dilation + H, :], w1_ref[k],
            preferred_element_type=jnp.float32)
    h1 = jnp.maximum(acc + b1_ref[...], 0.0)               # (H, Cout_p) f32

    # Rows of h1 that lie before t=0 are conv2's zero padding (not relu(b1)).
    if pad > 0:
        t0 = (pl.program_id(0) % T) * TL if T > 1 else 0
        rows = jax.lax.broadcasted_iota(jnp.int32, (H, 1), 0)
        h1 = jnp.where(rows >= pad - t0, h1, 0.0)
    h1 = h1.astype(jnp.bfloat16)

    # ---- causal dilated conv #2 + bias + ReLU (dropout2 = identity) ----
    acc2 = jnp.dot(h1[0:TL, :], w2_ref[0], preferred_element_type=jnp.float32)
    for k in range(1, K):
        acc2 = acc2 + jnp.dot(h1[k * dilation:k * dilation + TL, :], w2_ref[k],
                              preferred_element_type=jnp.float32)
    h2 = jnp.maximum(acc2 + b2_ref[...], 0.0)              # (TL, Cout_p) f32

    # ---- residual (read from the ref at point of use) + final ReLU ----
    x_tile = xw_ref[0, front:front + TL, :]                # current-tile rows of x
    if has_downsample:
        res = jnp.dot(x_tile, wd_ref[...],
                      preferred_element_type=jnp.float32) + bd_ref[...]
    else:
        res = x_tile.astype(jnp.float32)                   # Cin_p == Cout_p here

    out_ref[0] = jnp.maximum(h2 + res, 0.0)


@functools.partial(jax.jit, static_argnames=("kernel_size", "dilation"))
def temporal_block_forward(x, params, *, kernel_size, dilation):
    """Pallas TPU implementation of TemporalBlock.forward (eval mode).

    x : (B, C_in, L) float32  ->  (B, C_out, L) float32 (torch layout).
    """
    B, C_in, L = x.shape
    K = kernel_size
    pad = (K - 1) * dilation

    w1 = _weight_norm(params["conv1_v"], params["conv1_g"])     # (C_out, C_in, K)
    w2 = _weight_norm(params["conv2_v"], params["conv2_g"])     # (C_out, C_out, K)
    C_out = w1.shape[0]
    has_downsample = "down_w" in params

    cin_p = _round_up(C_in, LANE)
    cout_p = _round_up(C_out, LANE)

    # ---- per-generation VMEM budget & time-tile size ----
    try:
        vmem_cap = int(pltpu.get_tpu_info().vmem_capacity_bytes)
    except Exception:
        vmem_cap = 64 * 1024 * 1024                 # conservative (v7x physical)
    vmem_limit = int(min(vmem_cap * 3 // 4, 100 * 1024 * 1024))

    weight_bytes = (K * cin_p * cout_p + K * cout_p * cout_p
                    + cin_p * cout_p) * 2 + 3 * cout_p * 4
    budget = vmem_limit - weight_bytes - (2 << 20)   # headroom for compiler scratch

    front = _round_up(2 * pad, SUBLANE)              # halo rows (sublane-aligned)
    TL = max(SUBLANE, min(512, _round_up(L, SUBLANE)))
    while True:
        need = (2 * (front + TL) * cin_p * 2         # input window, bf16, 2 buffers
                + 2 * TL * cout_p * 4                # output tile, f32, 2 buffers
                + 3 * (pad + TL) * cout_p * 4)       # live acc / h1 / h2 values
        if need <= budget or TL <= SUBLANE:
            break
        TL = max(SUBLANE, _round_up(TL // 2, SUBLANE))
    W = front + TL
    L_pp = _round_up(L, TL)
    T = L_pp // TL

    # ---- lane-dense, time-major, bf16 overlapping input windows ----
    x_t = jnp.transpose(x, (0, 2, 1)).astype(jnp.float32)          # (B, L, C_in)
    x_t = jnp.pad(x_t, ((0, 0), (front, L_pp - L), (0, cin_p - C_in)))
    x_t = x_t.astype(jnp.bfloat16)                                  # (B, front+L_pp, cin_p)
    windows = jnp.stack([x_t[:, t * TL:t * TL + W, :] for t in range(T)], axis=1)
    windows = windows.reshape(B * T, W, cin_p)

    def pack_w(w, ci, ci_p):
        # (C_out, ci, K) -> (K, ci_p, C_out_p) tap-major, zero-padded, bf16.
        wt = jnp.transpose(w, (2, 1, 0))
        wt = jnp.pad(wt, ((0, 0), (0, ci_p - ci), (0, cout_p - C_out)))
        return wt.astype(jnp.bfloat16)

    w1_p = pack_w(w1, C_in, cin_p)
    w2_p = pack_w(w2, C_out, cout_p)
    b1_p = jnp.pad(params["conv1_b"], (0, cout_p - C_out)).reshape(1, cout_p).astype(jnp.float32)
    b2_p = jnp.pad(params["conv2_b"], (0, cout_p - C_out)).reshape(1, cout_p).astype(jnp.float32)

    if has_downsample:
        wd = jnp.transpose(params["down_w"][:, :, 0])               # (C_in, C_out)
        wd_p = jnp.pad(wd, ((0, cin_p - C_in), (0, cout_p - C_out))).astype(jnp.bfloat16)
        bd_p = jnp.pad(params["down_b"], (0, cout_p - C_out)).reshape(1, cout_p).astype(jnp.float32)
    else:
        wd_p = jnp.zeros((cin_p, cout_p), jnp.bfloat16)
        bd_p = jnp.zeros((1, cout_p), jnp.float32)

    kern = functools.partial(_temporal_block_kernel, K=K, dilation=dilation,
                             pad=pad, front=front, TL=TL, T=T,
                             has_downsample=has_downsample)

    const3 = lambda i: (0, 0, 0)
    const2 = lambda i: (0, 0)
    single = pl.Buffered(1)          # constant-index inputs: no double buffer

    out = pl.pallas_call(
        kern,
        out_shape=jax.ShapeDtypeStruct((B * T, TL, cout_p), jnp.float32),
        grid_spec=pltpu.PrefetchScalarGridSpec(
            num_scalar_prefetch=0,
            grid=(B * T,),
            in_specs=[
                pl.BlockSpec((1, W, cin_p), lambda i: (i, 0, 0)),
                pl.BlockSpec((K, cin_p, cout_p), const3, pipeline_mode=single),
                pl.BlockSpec((1, cout_p), const2, pipeline_mode=single),
                pl.BlockSpec((K, cout_p, cout_p), const3, pipeline_mode=single),
                pl.BlockSpec((1, cout_p), const2, pipeline_mode=single),
                pl.BlockSpec((cin_p, cout_p), const2, pipeline_mode=single),
                pl.BlockSpec((1, cout_p), const2, pipeline_mode=single),
            ],
            out_specs=pl.BlockSpec((1, TL, cout_p), lambda i: (i, 0, 0)),
        ),
        compiler_params=pltpu.CompilerParams(
            dimension_semantics=("parallel",),       # batch x time tiles across TCs
            vmem_limit_bytes=vmem_limit,
        ),
    )(windows, w1_p, b1_p, w2_p, b2_p, wd_p, bd_p)

    # Crop padding and return torch layout (B, C_out, L).
    out = out.reshape(B, L_pp, cout_p)[:, :L, :C_out]
    return jnp.transpose(out, (0, 2, 1))


def init_params(key, n_inputs, n_outputs, kernel_size):
    """Deterministic params mirroring the torch module (weight_norm v/g + biases)."""
    key, k1, k2, k3, k4, k5, k6, k7, k8 = jax.random.split(key, 9)
    params = dict(
        conv1_v=0.01 * jax.random.normal(k1, (n_outputs, n_inputs, kernel_size),
                                         jnp.float32),
        conv1_g=jax.random.uniform(k2, (n_outputs,), jnp.float32, 0.5, 1.5),
        conv1_b=0.01 * jax.random.normal(k3, (n_outputs,), jnp.float32),
        conv2_v=0.01 * jax.random.normal(k4, (n_outputs, n_outputs, kernel_size),
                                         jnp.float32),
        conv2_g=jax.random.uniform(k5, (n_outputs,), jnp.float32, 0.5, 1.5),
        conv2_b=0.01 * jax.random.normal(k6, (n_outputs,), jnp.float32),
    )
    if n_inputs != n_outputs:
        params["down_w"] = 0.01 * jax.random.normal(
            k7, (n_outputs, n_inputs, 1), jnp.float32)
        params["down_b"] = 0.01 * jax.random.normal(k8, (n_outputs,), jnp.float32)
    return params


def _reference(x, params, *, kernel_size, dilation):
    """Pure-JAX (f32) reference matching TemporalBlock.forward in eval mode."""
    pad = (kernel_size - 1) * dilation
    w1 = _weight_norm(params["conv1_v"], params["conv1_g"])
    w2 = _weight_norm(params["conv2_v"], params["conv2_g"])

    def causal_conv(inp, w, b):
        y = jax.lax.conv_general_dilated(
            inp, w, window_strides=(1,), padding=[(pad, pad)],
            rhs_dilation=(dilation,),
            dimension_numbers=("NCH", "OIH", "NCH"))
        y = y[:, :, :y.shape[2] - pad]                         # Chomp1d
        return y + b[None, :, None]

    h = jax.nn.relu(causal_conv(x, w1, params["conv1_b"]))     # relu1/dropout1
    h = jax.nn.relu(causal_conv(h, w2, params["conv2_b"]))     # relu2/dropout2
    if "down_w" in params:
        res = jax.lax.conv_general_dilated(
            x, params["down_w"], window_strides=(1,), padding=[(0, 0)],
            dimension_numbers=("NCH", "OIH", "NCH")) + params["down_b"][None, :, None]
    else:
        res = x
    return jax.nn.relu(h + res)


if __name__ == "__main__":
    # Small shapes consistent with the module: x is (batch, n_inputs, seq_len).
    batch, n_inputs, n_outputs, seq_len = 2, 4, 8, 16
    kernel_size, dilation = 3, 2
    # (stride fixed to 1, padding = (kernel_size-1)*dilation, as in the TCN)

    key = jax.random.PRNGKey(0)
    key, kx = jax.random.split(key)
    x = jax.random.normal(kx, (batch, n_inputs, seq_len), jnp.float32)
    params = init_params(key, n_inputs, n_outputs, kernel_size)

    out = temporal_block_forward(x, params,
                                 kernel_size=kernel_size, dilation=dilation)
    out = jax.block_until_ready(out)

    ref = jax.block_until_ready(
        _reference(x, params, kernel_size=kernel_size, dilation=dilation))

    assert out.shape == (batch, n_outputs, seq_len), out.shape
    # bf16 MXU operands (f32 accumulation) vs f32 reference -> loosened tolerance.
    assert jnp.allclose(out, ref, atol=5e-2, rtol=5e-2), (
        float(jnp.max(jnp.abs(out - ref))))

    print("KERNEL_OK")
</pallas_src>

<mosaic_0001>
module attributes {stable_mosaic.version = 11 : i64} {
  func.func @_temporal_block_kernel(%arg0: i32, %arg1: memref<1x32x128xbf16, #tpu.memory_space<vmem>>, %arg2: memref<3x128x128xbf16, #tpu.memory_space<vmem>>, %arg3: memref<1x128xf32, #tpu.memory_space<vmem>>, %arg4: memref<3x128x128xbf16, #tpu.memory_space<vmem>>, %arg5: memref<1x128xf32, #tpu.memory_space<vmem>>, %arg6: memref<128x128xbf16, #tpu.memory_space<vmem>>, %arg7: memref<1x128xf32, #tpu.memory_space<vmem>>, %arg8: memref<1x16x128xf32, #tpu.memory_space<vmem>>) attributes {dimension_semantics = [#tpu.dimension_semantics<parallel>], iteration_bounds = array<i64: 2>, scalar_prefetch = 0 : i64, scratch_operands = 0 : i64, tpu.core_type = #tpu.core_type<tc>, window_params = [{transform_indices = @transform_0, window_bounds = array<i64: 1, 32, 128>}, {pipeline_mode = #tpu.pipeline_mode<synchronous>, transform_indices = @transform_1, window_bounds = array<i64: 3, 128, 128>}, {pipeline_mode = #tpu.pipeline_mode<synchronous>, transform_indices = @transform_2, window_bounds = array<i64: 1, 128>}, {pipeline_mode = #tpu.pipeline_mode<synchronous>, transform_indices = @transform_3, window_bounds = array<i64: 3, 128, 128>}, {pipeline_mode = #tpu.pipeline_mode<synchronous>, transform_indices = @transform_4, window_bounds = array<i64: 1, 128>}, {pipeline_mode = #tpu.pipeline_mode<synchronous>, transform_indices = @transform_5, window_bounds = array<i64: 128, 128>}, {pipeline_mode = #tpu.pipeline_mode<synchronous>, transform_indices = @transform_6, window_bounds = array<i64: 1, 128>}, {transform_indices = @transform_7, window_bounds = array<i64: 1, 16, 128>}]} {
    %c0 = arith.constant 0 : index
    %c8 = arith.constant 8 : index
    %c0_0 = arith.constant 0 : index
    %0 = vector.load %arg1[%c0, %c8, %c0_0] : memref<1x32x128xbf16, #tpu.memory_space<vmem>>, vector<1x20x128xbf16>
    %1 = vector.shape_cast %0 : vector<1x20x128xbf16> to vector<20x128xbf16>
    %c0_1 = arith.constant 0 : index
    %c0_2 = arith.constant 0 : index
    %c0_3 = arith.constant 0 : index
    %2 = vector.load %arg2[%c0_1, %c0_2, %c0_3] : memref<3x128x128xbf16, #tpu.memory_space<vmem>>, vector<1x128x128xbf16>
    %3 = vector.shape_cast %2 : vector<1x128x128xbf16> to vector<128x128xbf16>
    %cst = arith.constant dense<0.000000e+00> : vector<20x128xf32>
    %4 = tpu.matmul %1, %3, %cst {dimension_numbers = #tpu.dot_dimension_numbers<[1], [0], [0], [1], [0, 0, 1, 1], [], []>} : vector<20x128xbf16>, vector<128x128xbf16>, vector<20x128xf32> -> vector<20x128xf32>
    %c0_4 = arith.constant 0 : index
    %c10 = arith.constant 10 : index
    %c0_5 = arith.constant 0 : index
    %5 = vector.load %arg1[%c0_4, %c10, %c0_5] : memref<1x32x128xbf16, #tpu.memory_space<vmem>>, vector<1x20x128xbf16>
    %6 = vector.shape_cast %5 : vector<1x20x128xbf16> to vector<20x128xbf16>
    %c1 = arith.constant 1 : index
    %c0_6 = arith.constant 0 : index
    %c0_7 = arith.constant 0 : index
    %7 = vector.load %arg2[%c1, %c0_6, %c0_7] : memref<3x128x128xbf16, #tpu.memory_space<vmem>>, vector<1x128x128xbf16>
    %8 = vector.shape_cast %7 : vector<1x128x128xbf16> to vector<128x128xbf16>
    %cst_8 = arith.constant dense<0.000000e+00> : vector<20x128xf32>
    %9 = tpu.matmul %6, %8, %cst_8 {dimension_numbers = #tpu.dot_dimension_numbers<[1], [0], [0], [1], [0, 0, 1, 1], [], []>} : vector<20x128xbf16>, vector<128x128xbf16>, vector<20x128xf32> -> vector<20x128xf32>
    %10 = arith.addf %4, %9 : vector<20x128xf32>
    %c0_9 = arith.constant 0 : index
    %c12 = arith.constant 12 : index
    %c0_10 = arith.constant 0 : index
    %11 = vector.load %arg1[%c0_9, %c12, %c0_10] : memref<1x32x128xbf16, #tpu.memory_space<vmem>>, vector<1x20x128xbf16>
    %12 = vector.shape_cast %11 : vector<1x20x128xbf16> to vector<20x128xbf16>
    %c2 = arith.constant 2 : index
    %c0_11 = arith.constant 0 : index
    %c0_12 = arith.constant 0 : index
    %13 = vector.load %arg2[%c2, %c0_11, %c0_12] : memref<3x128x128xbf16, #tpu.memory_space<vmem>>, vector<1x128x128xbf16>
    %14 = vector.shape_cast %13 : vector<1x128x128xbf16> to vector<128x128xbf16>
    %cst_13 = arith.constant dense<0.000000e+00> : vector<20x128xf32>
    %15 = tpu.matmul %12, %14, %cst_13 {dimension_numbers = #tpu.dot_dimension_numbers<[1], [0], [0], [1], [0, 0, 1, 1], [], []>} : vector<20x128xbf16>, vector<128x128xbf16>, vector<20x128xf32> -> vector<20x128xf32>
    %16 = arith.addf %10, %15 : vector<20x128xf32>
    %c0_14 = arith.constant 0 : index
    %c0_15 = arith.constant 0 : index
    %17 = vector.load %arg3[%c0_14, %c0_15] : memref<1x128xf32, #tpu.memory_space<vmem>>, vector<1x128xf32>
    %18 = vector.broadcast %17 : vector<1x128xf32> to vector<20x128xf32>
    %19 = arith.addf %16, %18 : vector<20x128xf32>
    %cst_16 = arith.constant 0.000000e+00 : f32
    %20 = vector.broadcast %cst_16 : f32 to vector<20x128xf32>
    %21 = arith.maximumf %19, %20 : vector<20x128xf32>
    %22 = tpu.iota {dimensions = array<i32: 0>} : vector<20x1xi32>
    %c4_i32 = arith.constant 4 : i32
    %23 = vector.broadcast %c4_i32 : i32 to vector<20x1xi32>
    %24 = arith.cmpi sge, %22, %23 : vector<20x1xi32>
    %cst_17 = arith.constant 0.000000e+00 : f32
    %25 = vector.shape_cast %24 : vector<20x1xi1> to vector<20x1xi1>
    %26 = vector.broadcast %25 : vector<20x1xi1> to vector<20x128xi1>
    %27 = vector.broadcast %cst_17 : f32 to vector<20x128xf32>
    %28 = arith.select %26, %21, %27 : vector<20x128xi1>, vector<20x128xf32>
    %29 = arith.truncf %28 : vector<20x128xf32> to vector<20x128xbf16>
    %30 = vector.extract_strided_slice %29 {offsets = [0, 0], sizes = [16, 128], strides = [1, 1]} : vector<20x128xbf16> to vector<16x128xbf16>
    %c0_18 = arith.constant 0 : index
    %c0_19 = arith.constant 0 : index
    %c0_20 = arith.constant 0 : index
    %31 = vector.load %arg4[%c0_18, %c0_19, %c0_20] : memref<3x128x128xbf16, #tpu.memory_space<vmem>>, vector<1x128x128xbf16>
    %32 = vector.shape_cast %31 : vector<1x128x128xbf16> to vector<128x128xbf16>
    %cst_21 = arith.constant dense<0.000000e+00> : vector<16x128xf32>
    %33 = tpu.matmul %30, %32, %cst_21 {dimension_numbers = #tpu.dot_dimension_numbers<[1], [0], [0], [1], [0, 0, 1, 1], [], []>} : vector<16x128xbf16>, vector<128x128xbf16>, vector<16x128xf32> -> vector<16x128xf32>
    %34 = vector.extract_strided_slice %29 {offsets = [2, 0], sizes = [16, 128], strides = [1, 1]} : vector<20x128xbf16> to vector<16x128xbf16>
    %c1_22 = arith.constant 1 : index
    %c0_23 = arith.constant 0 : index
    %c0_24 = arith.constant 0 : index
    %35 = vector.load %arg4[%c1_22, %c0_23, %c0_24] : memref<3x128x128xbf16, #tpu.memory_space<vmem>>, vector<1x128x128xbf16>
    %36 = vector.shape_cast %35 : vector<1x128x128xbf16> to vector<128x128xbf16>
    %cst_25 = arith.constant dense<0.000000e+00> : vector<16x128xf32>
    %37 = tpu.matmul %34, %36, %cst_25 {dimension_numbers = #tpu.dot_dimension_numbers<[1], [0], [0], [1], [0, 0, 1, 1], [], []>} : vector<16x128xbf16>, vector<128x128xbf16>, vector<16x128xf32> -> vector<16x128xf32>
    %38 = arith.addf %33, %37 : vector<16x128xf32>
    %39 = vector.extract_strided_slice %29 {offsets = [4, 0], sizes = [16, 128], strides = [1, 1]} : vector<20x128xbf16> to vector<16x128xbf16>
    %c2_26 = arith.constant 2 : index
    %c0_27 = arith.constant 0 : index
    %c0_28 = arith.constant 0 : index
    %40 = vector.load %arg4[%c2_26, %c0_27, %c0_28] : memref<3x128x128xbf16, #tpu.memory_space<vmem>>, vector<1x128x128xbf16>
    %41 = vector.shape_cast %40 : vector<1x128x128xbf16> to vector<128x128xbf16>
    %cst_29 = arith.constant dense<0.000000e+00> : vector<16x128xf32>
    %42 = tpu.matmul %39, %41, %cst_29 {dimension_numbers = #tpu.dot_dimension_numbers<[1], [0], [0], [1], [0, 0, 1, 1], [], []>} : vector<16x128xbf16>, vector<128x128xbf16>, vector<16x128xf32> -> vector<16x128xf32>
    %43 = arith.addf %38, %42 : vector<16x128xf32>
    %c0_30 = arith.constant 0 : index
    %c0_31 = arith.constant 0 : index
    %44 = vector.load %arg5[%c0_30, %c0_31] : memref<1x128xf32, #tpu.memory_space<vmem>>, vector<1x128xf32>
    %45 = vector.broadcast %44 : vector<1x128xf32> to vector<16x128xf32>
    %46 = arith.addf %43, %45 : vector<16x128xf32>
    %cst_32 = arith.constant 0.000000e+00 : f32
    %47 = vector.broadcast %cst_32 : f32 to vector<16x128xf32>
    %48 = arith.maximumf %46, %47 : vector<16x128xf32>
    %c0_33 = arith.constant 0 : index
    %c16 = arith.constant 16 : index
    %c0_34 = arith.constant 0 : index
    %49 = vector.load %arg1[%c0_33, %c16, %c0_34] : memref<1x32x128xbf16, #tpu.memory_space<vmem>>, vector<1x16x128xbf16>
    %50 = vector.shape_cast %49 : vector<1x16x128xbf16> to vector<16x128xbf16>
    %c0_35 = arith.constant 0 : index
    %c0_36 = arith.constant 0 : index
    %51 = vector.load %arg6[%c0_35, %c0_36] : memref<128x128xbf16, #tpu.memory_space<vmem>>, vector<128x128xbf16>
    %cst_37 = arith.constant dense<0.000000e+00> : vector<16x128xf32>
    %52 = tpu.matmul %50, %51, %cst_37 {dimension_numbers = #tpu.dot_dimension_numbers<[1], [0], [0], [1], [0, 0, 1, 1], [], []>} : vector<16x128xbf16>, vector<128x128xbf16>, vector<16x128xf32> -> vector<16x128xf32>
    %c0_38 = arith.constant 0 : index
    %c0_39 = arith.constant 0 : index
    %53 = vector.load %arg7[%c0_38, %c0_39] : memref<1x128xf32, #tpu.memory_space<vmem>>, vector<1x128xf32>
    %54 = vector.broadcast %53 : vector<1x128xf32> to vector<16x128xf32>
    %55 = arith.addf %52, %54 : vector<16x128xf32>
    %56 = arith.addf %48, %55 : vector<16x128xf32>
    %cst_40 = arith.constant 0.000000e+00 : f32
    %57 = vector.broadcast %cst_40 : f32 to vector<16x128xf32>
    %58 = arith.maximumf %56, %57 : vector<16x128xf32>
    %c0_41 = arith.constant 0 : index
    %c0_42 = arith.constant 0 : index
    %c0_43 = arith.constant 0 : index
    %59 = vector.load %arg8[%c0_41, %c0_42, %c0_43] : memref<1x16x128xf32, #tpu.memory_space<vmem>>, vector<1x16x128xf32>
    %60 = vector.shape_cast %59 : vector<1x16x128xf32> to vector<16x128xf32>
    %61 = vector.shape_cast %58 : vector<16x128xf32> to vector<1x16x128xf32>
    tpu.vector_store %arg8[%c0_41, %c0_42, %c0_43], %61 {strides = array<i32>} : memref<1x16x128xf32, #tpu.memory_space<vmem>>, vector<1x16x128xf32>,
    return
  }
  func.func @transform_0(%arg0: i32) -> (i32, i32, i32) {
    %c0_i32 = arith.constant 0 : i32
    %c0_i32_0 = arith.constant 0 : i32
    %c0_i32_1 = arith.constant 0 : i32
    return %arg0, %c0_i32, %c0_i32_0 : i32, i32, i32
  }
  func.func @transform_1(%arg0: i32) -> (i32, i32, i32) {
    %c0_i32 = arith.constant 0 : i32
    %c0_i32_0 = arith.constant 0 : i32
    %c0_i32_1 = arith.constant 0 : i32
    %c0_i32_2 = arith.constant 0 : i32
    return %c0_i32, %c0_i32_0, %c0_i32_1 : i32, i32, i32
  }
  func.func @transform_2(%arg0: i32) -> (i32, i32) {
    %c0_i32 = arith.constant 0 : i32
    %c0_i32_0 = arith.constant 0 : i32
    %c0_i32_1 = arith.constant 0 : i32
    return %c0_i32, %c0_i32_0 : i32, i32
  }
  func.func @transform_3(%arg0: i32) -> (i32, i32, i32) {
    %c0_i32 = arith.constant 0 : i32
    %c0_i32_0 = arith.constant 0 : i32
    %c0_i32_1 = arith.constant 0 : i32
    %c0_i32_2 = arith.constant 0 : i32
    return %c0_i32, %c0_i32_0, %c0_i32_1 : i32, i32, i32
  }
  func.func @transform_4(%arg0: i32) -> (i32, i32) {
    %c0_i32 = arith.constant 0 : i32
    %c0_i32_0 = arith.constant 0 : i32
    %c0_i32_1 = arith.constant 0 : i32
    return %c0_i32, %c0_i32_0 : i32, i32
  }
  func.func @transform_5(%arg0: i32) -> (i32, i32) {
    %c0_i32 = arith.constant 0 : i32
    %c0_i32_0 = arith.constant 0 : i32
    %c0_i32_1 = arith.constant 0 : i32
    return %c0_i32, %c0_i32_0 : i32, i32
  }
  func.func @transform_6(%arg0: i32) -> (i32, i32) {
    %c0_i32 = arith.constant 0 : i32
    %c0_i32_0 = arith.constant 0 : i32
    %c0_i32_1 = arith.constant 0 : i32
    return %c0_i32, %c0_i32_0 : i32, i32
  }
  func.func @transform_7(%arg0: i32) -> (i32, i32, i32) {
    %c0_i32 = arith.constant 0 : i32
    %c0_i32_0 = arith.constant 0 : i32
    %c0_i32_1 = arith.constant 0 : i32
    return %arg0, %c0_i32, %c0_i32_0 : i32, i32, i32
  }
}

</mosaic_0001>

<bundles_post_ra>
// kernel: temporal_block_forward.1
= control target key start
LH: loop header
LB: loop body
LE: loop exit
PB: predicated region body
PF: predicated region fallthrough
CT: control target
= control target key end

     0   :  { %s1685_s24 = smov 0   ;;  %s1950_s0 = inlined_call_operand.vmem [shape: bf16[2,32,128], index: 0, kind: input, shape index: {}]   ;;  %s1951_s1 = inlined_call_operand.vmem [shape: bf16[3,128,128], index: 1, kind: input, shape index: {}]   ;;  %s1952_s2 = inlined_call_operand.vmem [shape: f32[1,128], index: 2, kind: input, shape index: {}]   ;;  %s1953_s3 = inlined_call_operand.vmem [shape: bf16[3,128,128], index: 3, kind: input, shape index: {}]   ;;  %s1954_s4 = inlined_call_operand.vmem [shape: f32[1,128], index: 4, kind: input, shape index: {}]   ;;  %s1955_s5 = inlined_call_operand.vmem [shape: bf16[128,128], index: 5, kind: input, shape index: {}]   ;;  %s1956_s6 = inlined_call_operand.vmem [shape: f32[1,128], index: 6, kind: input, shape index: {}]   ;;  %s1957_s7 = inlined_call_operand.vmem [shape: f32[2,16,128], index: 7, kind: output, shape index: {}]  }
   0x1 LB: > { %s1208_s25 = sadd.s32 4294967295, %s1640_s24   ;;  %p1212_p0 = scmp.ge.s32.totalorder %s1640_s24, 1  ;;  %s1640_s24 = sphi %s1685_s24, %s17_s24  }
   0x2   : > { %p237_p1 = scmp.lt.s32.totalorder %s1640_s24, 3 }
   0x4   : > { %p238_p2 = pnand %p1212_p0, %p237_p1 }
   0x5   : > { %v1571_v0 = vld [vmem:[%s1951_s1 + $0x40] sm:$0xff] (!%p238_p2)   ;;  %v1573_v2 = vld [vmem:[%s1951_s1 + $0x48] sm:$0xff] (!%p238_p2)   ;;  %p269_p3 = scmp.lt.s32.totalorder (!%p238_p2), %s1208_s25, 1  ;;  %v1575_v4 = vld [vmem:[%s1951_s1 + $0x50] sm:$0xff] (!%p238_p2)   ;;  %vm326_vm0 = vcmask (!%p238_p2), 1046528   ;;  %vm557_vm1 = vcmask (!%p238_p2), 1045504  }
   0x6   : > { %241 = sbr.rel (%p238_p2) target bundleno = 553 (0x229), region = 48  ;;  %v1572_v1 = vld [vmem:[%s1951_s1] sm:$0xff] (!%p238_p2)   ;;  %1420 = vmatprep.subr.bf16.mxu0 (!%p238_p2), %v1571_v0  ;;  %v1574_v3 = vld [vmem:[%s1951_s1 + $0x8] sm:$0xff] (!%p238_p2)   ;;  %v1576_v5 = vld [vmem:[%s1951_s1 + $0x10] sm:$0xff] (!%p238_p2)   ;;  %v1642_v43 = vmov (!%p238_p2), 0.0   ;;  %vm1643_vm2 = vmmov (!%p238_p2), 0  }
   0x7   : > { %1440 = vmatprep.subr.bf16.mxu1 (!%p238_p2), %v1572_v1  ;;  %1421 = vmatpush3.bf16.msra.mxu0 (!%p238_p2), %v1571_v0  ;;  %v1577_v6 = vld [vmem:[%s1951_s1 + $0x58] sm:$0xff] (!%p238_p2)   ;;  %v1579_v8 = vld [vmem:[%s1951_s1 + $0x60] sm:$0xff] (!%p238_p2)   ;;  %v1581_v10 = vld [vmem:[%s1951_s1 + $0x68] sm:$0xff] (!%p238_p2)   ;;  %vm1644_vm4 = vmmov (!%p238_p2), 1  }
   0x8   : > { %1441 = vmatpush3.bf16.msra.mxu1 (!%p238_p2), %v1572_v1  ;;  %1422 = vmatprep.subr.bf16.mxu0 (!%p238_p2), %v1573_v2  ;;  %v1578_v7 = vld [vmem:[%s1951_s1 + $0x18] sm:$0xff] (!%p238_p2)   ;;  %v1580_v9 = vld [vmem:[%s1951_s1 + $0x20] sm:$0xff] (!%p238_p2)   ;;  %v1582_v13 = vld [vmem:[%s1951_s1 + $0x28] sm:$0xff] (!%p238_p2)  }
   0x9   : > { %1442 = vmatprep.subr.bf16.mxu1 (!%p238_p2), %v1574_v3  ;;  %v1583_v17 = vld [vmem:[%s1951_s1 + $0x70] sm:$0xff] (!%p238_p2)   ;;  %v1585_v23 = vld [vmem:[%s1951_s1 + $0x78] sm:$0xff] (!%p238_p2)   ;;  %v1591_v25 = vld [vmem:[%s1951_s1 + $0x80] sm:$0xff] (!%p238_p2)  }
   0xa   : > { %v1584_v21 = vld [vmem:[%s1951_s1 + $0x30] sm:$0xff] (!%p238_p2)   ;;  %v1586_v24 = vld [vmem:[%s1951_s1 + $0x38] sm:$0xff] (!%p238_p2)   ;;  %v1592_v32 = vld [vmem:[%s1951_s1 + $0x88] sm:$0xff] (!%p238_p2)  }
   0xb   : > { %1423 = vmatpush3.bf16.msra.mxu0 (!%p238_p2), %v1573_v2  ;;  %v1593_v35 = vld [vmem:[%s1951_s1 + $0x90] sm:$0xff] (!%p238_p2)   ;;  %v1594_v36 = vld [vmem:[%s1951_s1 + $0x98] sm:$0xff] (!%p238_p2)   ;;  %v1595_v37 = vld [vmem:[%s1951_s1 + $0xa0] sm:$0xff] (!%p238_p2)  }
   0xc   : > { %1443 = vmatpush3.bf16.msra.mxu1 (!%p238_p2), %v1574_v3  ;;  %1424 = vmatprep.subr.bf16.mxu0 (!%p238_p2), %v1575_v4  ;;  %v1596_v38 = vld [vmem:[%s1951_s1 + $0xa8] sm:$0xff] (!%p238_p2)   ;;  %v1597_v39 = vld [vmem:[%s1951_s1 + $0xb0] sm:$0xff] (!%p238_p2)   ;;  %v1598_v40 = vld [vmem:[%s1951_s1 + $0xb8] sm:$0xff] (!%p238_p2)  }
   0xd   : > { %s1959_s25 = smov (!%p269_p3, %s1208_s25), 1  ;;  %1444 = vmatprep.subr.bf16.mxu1 %v1576_v5  ;;  %v1601_v41 = vld [vmem:[%s1953_s3] sm:$0xff]   ;;  %v1603_v44 = vld [vmem:[%s1953_s3 + $0x8] sm:$0xff]   ;;  %v1605_v46 = vld [vmem:[%s1953_s3 + $0x10] sm:$0xff]  }
   0xe   : > { %s1352_s19 = sshll.u32 %s1959_s25, 4  ;;  %v1602_v42 = vld [vmem:[%s1953_s3 + $0x40] sm:$0xff]   ;;  %v1604_v45 = vld [vmem:[%s1953_s3 + $0x48] sm:$0xff]   ;;  %v1606_v47 = vld [vmem:[%s1953_s3 + $0x50] sm:$0xff]  }
   0xf   : > { %1425 = vmatpush3.bf16.msra.mxu0 %v1575_v4  ;;  %s1731_s28 = scalar_lea.vmem %s1950_s0, %s1352_s19  ;;  %v1607_v48 = vld [vmem:[%s1953_s3 + $0x18] sm:$0xff]   ;;  %v1609_v50 = vld [vmem:[%s1953_s3 + $0x20] sm:$0xff]   ;;  %v1611_v52 = vld [vmem:[%s1953_s3 + $0x28] sm:$0xff]   ;;  %s278_s29 = scalar_lea.vmem %s1957_s7, %s1352_s19 }
  0x10   : > { %1445 = vmatpush3.bf16.msra.mxu1 %v1576_v5  ;;  %1426 = vmatprep.subr.bf16.mxu0 %v1577_v6  ;;  %v1737_v11 = vld [vmem:[%s1731_s28 + $0x8] sm:$0xf]  ;;  %v299_v12 = vld [vmem:[%s1731_s28 + $0x4] sm:$0xe]  ;;  %v1765_v27 = vld [vmem:[%s1731_s28 + $0xc] sm:$0xf]  ;;  %v675_v5 = vlaneseq }
  0x11   : > { %1446 = vmatprep.subr.bf16.mxu1 %v1578_v7  ;;  %v1233_v14 = vcombine.low %v299_v12, %v1737_v11  ;;  %v1588_v15 = vld [vmem:[%s1731_s28 + $0xc] ss:$0 sps:$4 sm:$0x77]   ;;  %v280_v16 = vld [vmem:[%s1731_s28 + $0x4] sm:$0xf]  ;;  %v1270_v29 = vcombine.low %v1765_v27, %v1765_v27  ;;  %v1608_v49 = vld [vmem:[%s1953_s3 + $0x58] sm:$0xff]  }
  0x12   : > { %v1243_v18 = vcombine.low %v280_v16, %v1737_v11  ;;  %v328_v20 = vrot.slane %v1588_v15, 1  ;;  %v532_v26 = vld [vmem:[%s1731_s28 + $0x4] sm:$0xc]  ;;  %v1590_v30 = vld [vmem:[%s1731_s28 + $0xc] ss:$0 sps:$4 sm:$0x33]  }
  0x13   : > { %1427 = vmatpush3.bf16.msra.mxu0 %v1577_v6  ;;  %v327_v19 = vrot.slane %v1233_v14, 1  ;;  %v1269_v28 = vcombine.low %v532_v26, %v1737_v11  ;;  %v559_v33 = vrot.slane %v1270_v29, 2  ;;  %v1610_v51 = vld [vmem:[%s1953_s3 + $0x60] sm:$0xff]   ;;  %v1612_v53 = vld [vmem:[%s1953_s3 + $0x68] sm:$0xff]   ;;  %v1613_v54 = vld [vmem:[%s1953_s3 + $0x30] sm:$0xff]  }
  0x14   : > { %1447 = vmatpush3.bf16.msra.mxu1 %v1578_v7  ;;  %1428 = vmatprep.subr.bf16.mxu0 %v1579_v8  ;;  %v1614_v55 = vld [vmem:[%s1953_s3 + $0x70] sm:$0xff]   ;;  %v1615_v56 = vld [vmem:[%s1953_s3 + $0x38] sm:$0xff]   ;;  %v1279_v7 = vld [vmem:[%s1952_s2] ss:$0 sm:$0xff] }
  0x15   : > { %1448 = vmatprep.subr.bf16.mxu1 %v1580_v9  ;;  %v329_v22 = vsel %vm326_vm0, %v327_v19, %v328_v20  ;;  %1456 = vmatprep.mubr.bf16.mxu1 %v1243_v18  ;;  %v558_v31 = vrot.slane %v1269_v28, 2  ;;  %v1616_v57 = vld [vmem:[%s1953_s3 + $0x78] sm:$0xff]  }
  0x16   : > { %1436 = vmatprep.mubr.bf16.mxu0 %v329_v22 }
  0x17   : > { %1429 = vmatpush3.bf16.msra.mxu0 %v1579_v8  ;;  %v560_v34 = vsel %vm557_vm1, %v558_v31, %v559_v33 }
  0x18   : > { %1449 = vmatpush3.bf16.msra.mxu1 %v1580_v9  ;;  %1430 = vmatprep.subr.bf16.mxu0 %v1581_v10 }
  0x19   : > { %1450 = vmatprep.subr.bf16.mxu1 %v1582_v13 }
  0x1b   : > { %1431 = vmatpush3.bf16.msra.mxu0 %v1581_v10  ;;  %v676_v10 = vshrl.u32 %v675_v5, 7 }
  0x1c   : > { %1451 = vmatpush3.bf16.msra.mxu1 %v1582_v13  ;;  %1432 = vmatprep.subr.bf16.mxu0 %v1583_v17 }
  0x1d   : > { %1452 = vmatprep.subr.bf16.mxu1 %v1584_v21  ;;  %vm679_vm3 = vcmp.ge.s32.totalorder %v676_v10, 4 }
  0x1e   : > { %vm1312_vm5 = vmpackc.low %vm1644_vm4, %vm679_vm3 }
  0x1f   : > { %1433 = vmatpush3.bf16.msra.mxu0 %v1583_v17 }
  0x20   : > { %1453 = vmatpush3.bf16.msra.mxu1 %v1584_v21  ;;  %1434 = vmatprep.subr.bf16.mxu0 %v1585_v23 }
  0x21   : > { %1454 = vmatprep.subr.bf16.mxu1 %v1586_v24 }
  0x23   : > { %1435 = vmatpush3.bf16.msra.mxu0 %v1585_v23 }
  0x24   : > { %1455 = vmatpush3.bf16.msra.mxu1 %v1586_v24  ;;  %1460 = vmatprep.subr.bf16.mxu0 %v1591_v25  ;;  %v1618_v24 = vld [vmem:[%s1955_s5] sm:$0xff]  }
  0x25   : > { %1480 = vmatprep.subr.bf16.mxu1 %v1642_v43 }
  0x26   : > { %1437 = vmatmul.mubr.bf16.vlgmr.msra.gmra.mrb[0].mxu0 %v328_v20 }
  0x27   : > { %1457 = vmatmul.mubr.bf16.vlgmr.msra.gmra.mrb[0].mxu1 %v1590_v30  ;;  %1461 = vmatpush3.bf16.msra.mxu0 %v1591_v25 }
  0x28   : > { %1462 = vmatprep.subr.bf16.mxu0 %v1592_v32  ;;  %1476 = vmatprep.mubr.bf16.mxu0 %v560_v34 }
  0x29   : > { %1481 = vmatpush3.bf16.msra.mxu1 %v1602_v42  ;;  %1496 = vmatprep.mubr.msk.bf16.mxu1 %vm1643_vm2, %v1642_v43  ;;  %v1625_v42 = vld [vmem:[%s1953_s3 + $0xa0] sm:$0xff]  }
  0x2a   : > { %1482 = vmatprep.subr.bf16.mxu1 %v1642_v43 }
  0x2b   : > { %1463 = vmatpush3.bf16.msra.mxu0 %v1592_v32  ;;  %v1617_v32 = vld [vmem:[%s1953_s3 + $0x80] sm:$0xff]  }
  0x2c   : > { %1464 = vmatprep.subr.bf16.mxu0 %v1593_v35 }
  0x2d   : > { %1483 = vmatpush3.bf16.msra.mxu1 %v1604_v45  ;;  %v1627_v45 = vld [vmem:[%s1953_s3 + $0xa8] sm:$0xff]  }
  0x2e   : > { %1484 = vmatprep.subr.bf16.mxu1 %v1642_v43 }
  0x2f   : > { %1465 = vmatpush3.bf16.msra.mxu0 %v1593_v35 }
  0x30   : > { %1466 = vmatprep.subr.bf16.mxu0 %v1594_v36 }
  0x31   : > { %1485 = vmatpush3.bf16.msra.mxu1 %v1606_v47  ;;  %v1629_v47 = vld [vmem:[%s1953_s3 + $0xb0] sm:$0xff]  }
  0x32   : > { %1486 = vmatprep.subr.bf16.mxu1 %v1642_v43 }
  0x33   : > { %1467 = vmatpush3.bf16.msra.mxu0 %v1594_v36  ;;  %v1619_v36 = vld [vmem:[%s1953_s3 + $0x88] sm:$0xff]  }
  0x34   : > { %1468 = vmatprep.subr.bf16.mxu0 %v1595_v37 }
  0x35   : > { %1487 = vmatpush3.bf16.msra.mxu1 %v1608_v49  ;;  %v1631_v49 = vld [vmem:[%s1953_s3 + $0xb8] sm:$0xff]  }
  0x36   : > { %1488 = vmatprep.subr.bf16.mxu1 %v1642_v43 }
  0x37   : > { %1469 = vmatpush3.bf16.msra.mxu0 %v1595_v37  ;;  %v1622_v37 = vld [vmem:[%s1955_s5 + $0x10] sm:$0xff]  }
  0x38   : > { %1470 = vmatprep.subr.bf16.mxu0 %v1596_v38 }
  0x39   : > { %1489 = vmatpush3.bf16.msra.mxu1 %v1610_v51 }
  0x3a   : > { %1490 = vmatprep.subr.bf16.mxu1 %v1642_v43 }
  0x3b   : > { %1471 = vmatpush3.bf16.msra.mxu0 %v1596_v38  ;;  %v1621_v38 = vld [vmem:[%s1953_s3 + $0x90] sm:$0xff]  }
  0x3c   : > { %1472 = vmatprep.subr.bf16.mxu0 %v1597_v39 }
  0x3d   : > { %1491 = vmatpush3.bf16.msra.mxu1 %v1612_v53 }
  0x3e   : > { %1492 = vmatprep.subr.bf16.mxu1 %v1642_v43 }
  0x3f   : > { %1473 = vmatpush3.bf16.msra.mxu0 %v1597_v39  ;;  %v1624_v39 = vld [vmem:[%s1955_s5 + $0x18] sm:$0xff]  }
  0x40   : > { %1474 = vmatprep.subr.bf16.mxu0 %v1598_v40 }
  0x41   : > { %1493 = vmatpush3.bf16.msra.mxu1 %v1614_v55 }
  0x42   : > { %1494 = vmatprep.subr.bf16.mxu1 %v1642_v43 }
  0x43   : > { %1475 = vmatpush3.bf16.msra.mxu0 %v1598_v40  ;;  %v1623_v40 = vld [vmem:[%s1953_s3 + $0x98] sm:$0xff]  }
  0x44   : > { %1500 = vmatprep.subr.bf16.mxu0 %v1642_v43 }
  0x45   : > { %1495 = vmatpush3.bf16.msra.mxu1 %v1616_v57 }
  0x46   : > { %1477 = vmatmul.mubr.bf16.vlgmr.msra.gmra.mrb[4].mxu0 %v559_v33  ;;  %1520 = vmatprep.subr.bf16.mxu1 %v1642_v43  ;;  %v1620_v33 = vld [vmem:[%s1955_s5 + $0x8] sm:$0xff]  }
  0x47   : > { %1501 = vmatpush3.bf16.msra.mxu0 %v1601_v41  ;;  %1516 = vmatprep.mubr.msk.bf16.mxu0 %vm1643_vm2, %v1642_v43  ;;  %v1626_v41 = vld [vmem:[%s1955_s5 + $0x20] sm:$0xff]  }
  0x48   : > { %1502 = vmatprep.subr.bf16.mxu0 %v1642_v43 }
  0x4b   : > { %1503 = vmatpush3.bf16.msra.mxu0 %v1603_v44  ;;  %v1628_v44 = vld [vmem:[%s1955_s5 + $0x28] sm:$0xff]  }
  0x4c   : > { %1504 = vmatprep.subr.bf16.mxu0 %v1642_v43 }
  0x4f   : > { %1505 = vmatpush3.bf16.msra.mxu0 %v1605_v46  ;;  %v1630_v46 = vld [vmem:[%s1955_s5 + $0x30] sm:$0xff]  }
  0x50   : > { %1506 = vmatprep.subr.bf16.mxu0 %v1642_v43 }
  0x53   : > { %1507 = vmatpush3.bf16.msra.mxu0 %v1607_v48  ;;  %v1632_v48 = vld [vmem:[%s1955_s5 + $0x38] sm:$0xff]  }
  0x54   : > { %1508 = vmatprep.subr.bf16.mxu0 %v1642_v43 }
  0x57   : > { %1509 = vmatpush3.bf16.msra.mxu0 %v1609_v50  ;;  %v1341_v50 = vcombine.low %v1737_v11, %v1765_v27  ;;  %v1339_v27 = vld [vmem:[%s1954_s4] ss:$0 sm:$0xff] }
  0x58   : > { %1510 = vmatprep.subr.bf16.mxu0 %v1642_v43 }
  0x5b   : > { %1511 = vmatpush3.bf16.msra.mxu0 %v1611_v52 }
  0x5c   : > { %1512 = vmatprep.subr.bf16.mxu0 %v1642_v43 }
  0x5f   : > { %1513 = vmatpush3.bf16.msra.mxu0 %v1613_v54 }
  0x60   : > { %1514 = vmatprep.subr.bf16.mxu0 %v1642_v43 }
  0x63   : > { %1515 = vmatpush3.bf16.msra.mxu0 %v1615_v56 }
  0x64   : > { %1540 = vmatprep.subr.bf16.mxu0 %v1642_v43 }
  0xf9   : > { %v1438_v58 = vpop.f32.mrb[0].mxu0 }
  0xfa   : > { %v1458_v59 = vpop.f32.mrb[0].mxu1  ;;  %v414_v60 = vpop.f32.mrb[1].mxu0 }
  0xfb   : > { %v527_v61 = vadd.f32 %v1458_v59, %v1438_v58  ;;  %v518_v62 = vpop.f32.mrb[1].mxu1  ;;  %v1439_v63 = vpop.f32.mrb[2].mxu0 }
  0xfc   : > { %v519_v0 = vadd.f32 %v518_v62, %v414_v60  ;;  %v1459_v1 = vpop.f32.mrb[2].mxu1  ;;  %v417_v2 = vpop.f32.mrb[3].mxu0 }
  0xfd   : > { %v521_v3 = vpop.f32.mrb[3].mxu1 }
  0xfe   : > { %v522_v4 = vadd.f32 %v521_v3, %v417_v2 }
 0x119   : > { %v1478_v6 = vpop.f32.mrb[4].mxu0 }
 0x11a   : > { %v661_v8 = vadd.f32 %v1478_v6, %v527_v61  ;;  %v645_v9 = vpop.f32.mrb[5].mxu0 }
 0x11b   : > { %v659_v12 = vadd.f32 %v645_v9, %v519_v0  ;;  %v1479_v13 = vpop.f32.mrb[6].mxu0 }
 0x11c   : > { %v671_v14 = vadd.f32 %v1279_v7, %v661_v8  ;;  %v648_v15 = vpop.f32.mrb[7].mxu0 }
 0x11d   : > { %v669_v16 = vadd.f32 %v1279_v7, %v659_v12  ;;  %v660_v17 = vadd.f32 %v648_v15, %v522_v4 }
 0x11e   : > { %v674_v18 = vmax.f32 %v671_v14, 0.0 }
 0x11f   : > { %v672_v19 = vmax.f32 %v669_v16, 0.0  ;;  %v670_v20 = vadd.f32 %v1279_v7, %v660_v17 }
 0x120   : > { %v692_v21 = vpack.c.bf16 %v674_v18, %v674_v18 }
 0x121   : > { %v688_v22 = vsel %vm679_vm3, %v672_v19, 0.0  ;;  %v673_v23 = vmax.f32 %v670_v20, 0.0 }
 0x122   : > { %v729_v28 = vrot.slane %v692_v21, 1  ;;  %v928_v29 = vrot.slane %v692_v21, 2 }
 0x123   : > { %v691_v25 = vpack.c.bf16 %v673_v23, %v688_v22  ;;  %v1313_v26 = vpack.c.bf16 %v673_v23, %v672_v19 }
 0x125   : > { %v728_v30 = vrot.slane %v691_v25, 1  ;;  %v927_v31 = vrot.slane %v691_v25, 2  ;;  %1517 = vmatmul.mubr.msk.bf16.vlgmr.msra.gmra.mrb[8].mxu0 %vm1312_vm5, %v1313_v26 }
 0x126   : > { %1541 = vmatpush3.bf16.msra.mxu0 %v1618_v24  ;;  %1556 = vmatprep.mubr.msk.bf16.mxu0 %vm1643_vm2, %v1642_v43 }
 0x127   : > { %v730_v34 = vsel %vm326_vm0, %v728_v30, %v729_v28  ;;  %1542 = vmatprep.subr.bf16.mxu0 %v1642_v43  ;;  %v929_v35 = vsel %vm557_vm1, %v927_v31, %v928_v29 }
 0x128   : > { %1497 = vmatmul.mubr.bf16.vlgmr.msra.gmra.mrb[4].mxu1 %v730_v34 }
 0x129   : > { %1521 = vmatpush3.bf16.msra.mxu1 %v1617_v32  ;;  %1536 = vmatprep.mubr.msk.bf16.mxu1 %vm1643_vm2, %v1642_v43 }
 0x12a   : > { %1522 = vmatprep.subr.bf16.mxu1 %v1642_v43  ;;  %1543 = vmatpush3.bf16.msra.mxu0 %v1620_v33 }
 0x12b   : > { %1544 = vmatprep.subr.bf16.mxu0 %v1642_v43 }
 0x12d   : > { %1523 = vmatpush3.bf16.msra.mxu1 %v1619_v36 }
 0x12e   : > { %1524 = vmatprep.subr.bf16.mxu1 %v1642_v43  ;;  %1545 = vmatpush3.bf16.msra.mxu0 %v1622_v37 }
 0x12f   : > { %1546 = vmatprep.subr.bf16.mxu0 %v1642_v43 }
 0x131   : > { %1525 = vmatpush3.bf16.msra.mxu1 %v1621_v38 }
 0x132   : > { %1526 = vmatprep.subr.bf16.mxu1 %v1642_v43  ;;  %1547 = vmatpush3.bf16.msra.mxu0 %v1624_v39 }
 0x133   : > { %1548 = vmatprep.subr.bf16.mxu0 %v1642_v43 }
 0x135   : > { %1527 = vmatpush3.bf16.msra.mxu1 %v1623_v40 }
 0x136   : > { %1528 = vmatprep.subr.bf16.mxu1 %v1642_v43  ;;  %1549 = vmatpush3.bf16.msra.mxu0 %v1626_v41 }
 0x137   : > { %1550 = vmatprep.subr.bf16.mxu0 %v1642_v43 }
 0x139   : > { %1529 = vmatpush3.bf16.msra.mxu1 %v1625_v42 }
 0x13a   : > { %1530 = vmatprep.subr.bf16.mxu1 %v1642_v43  ;;  %1551 = vmatpush3.bf16.msra.mxu0 %v1628_v44 }
 0x13b   : > { %1552 = vmatprep.subr.bf16.mxu0 %v1642_v43 }
 0x13d   : > { %1531 = vmatpush3.bf16.msra.mxu1 %v1627_v45 }
 0x13e   : > { %1532 = vmatprep.subr.bf16.mxu1 %v1642_v43  ;;  %1553 = vmatpush3.bf16.msra.mxu0 %v1630_v46 }
 0x13f   : > { %1554 = vmatprep.subr.bf16.mxu0 %v1642_v43 }
 0x141   : > { %1533 = vmatpush3.bf16.msra.mxu1 %v1629_v47 }
 0x142   : > { %1534 = vmatprep.subr.bf16.mxu1 %v1642_v43  ;;  %1555 = vmatpush3.bf16.msra.mxu0 %v1632_v48  ;;  %v1340_v43 = vld [vmem:[%s1956_s6] ss:$0 sm:$0xff] }
 0x145   : > { %1535 = vmatpush3.bf16.msra.mxu1 %v1631_v49  ;;  %1557 = vmatmul.mubr.bf16.vlgmr.msra.gmra.mrb[12].mxu0 %v1341_v50 }
 0x148   : > { %1537 = vmatmul.mubr.bf16.vlgmr.msra.gmra.mrb[8].mxu1 %v929_v35 }
 0x1f8   : > { %v903_v51 = vpop.f32.mrb[8].mxu0 }
 0x1f9   : > { %v1518_v52 = vpop.f32.mrb[9].mxu0 }
 0x1fa   : > { %v906_v53 = vpop.f32.mrb[10].mxu0 }
 0x1fb   : > { %v814_v54 = vpop.f32.mrb[4].mxu1  ;;  %v1519_v55 = vpop.f32.mrb[11].mxu0 }
 0x1fc   : > { %v904_v56 = vadd.f32 %v903_v51, %v814_v54  ;;  %v1498_v57 = vpop.f32.mrb[5].mxu1 }
 0x1fd   : > { %v817_v58 = vpop.f32.mrb[6].mxu1 }
 0x1fe   : > { %v907_v59 = vadd.f32 %v906_v53, %v817_v58  ;;  %v1499_v60 = vpop.f32.mrb[7].mxu1 }
 0x218   : > { %v1140_v61 = vpop.f32.mrb[12].mxu0 }
 0x219   : > { %v1558_v62 = vpop.f32.mrb[13].mxu0  ;;  %v1141_v5 = vadd.f32 %v1340_v43, %v1140_v61 }
 0x21a   : > { %v1143_v63 = vpop.f32.mrb[14].mxu0 }
 0x21b   : > { %v1013_v11 = vpop.f32.mrb[8].mxu1  ;;  %v1559_v0 = vpop.f32.mrb[15].mxu0  ;;  %v1144_v13 = vadd.f32 %v1340_v43, %v1143_v63 }
 0x21c   : > { %v1020_v1 = vadd.f32 %v1013_v11, %v904_v56  ;;  %v1538_v2 = vpop.f32.mrb[9].mxu1 }
 0x21d   : > { %v1016_v3 = vpop.f32.mrb[10].mxu1 }
 0x21e   : > { %v1029_v4 = vadd.f32 %v1339_v27, %v1020_v1  ;;  %v1021_v6 = vadd.f32 %v1016_v3, %v907_v59  ;;  %v1539_v7 = vpop.f32.mrb[11].mxu1 }
 0x220   : > { %v1031_v8 = vmax.f32 %v1029_v4, 0.0  ;;  %v1030_v9 = vadd.f32 %v1339_v27, %v1021_v6 }
 0x222   : > { %v1147_v10 = vadd.f32 %v1141_v5, %v1031_v8  ;;  %v1032_v12 = vmax.f32 %v1030_v9, 0.0 }
 0x224   : > { %v1149_v14 = vmax.f32 %v1147_v10, 0.0  ;;  %v1148_v15 = vadd.f32 %v1144_v13, %v1032_v12 }
 0x226   : > { %1151 = vst [vmem:[%s278_s29] sm:$0xff] %v1149_v14  ;;  %v1150_v16 = vmax.f32 %v1148_v15, 0.0 }
 0x228   : > { %1152 = vst [vmem:[%s278_s29 + $0x8] sm:$0xff] %v1150_v16 }
 0x229 PF: > { %s17_s24 = sadd.s32 1, %s1640_s24  }
 0x22a   : > { %p14_p4 = scmp.ge.s32.totalorder %s17_s24, 4  }
 0x22c   :  { %16 = sbr.rel (!%p14_p4) target bundleno = 1 (0x1), region = 82 }

</bundles_post_ra>
